<compile_context>
chip_gen: v6e
topology: v6e:2x2x1
jax: 0.10.0
libtpu: 0.0.40
codegen_flags: <defaults>
</compile_context>

<pallas_src>
import functools

import jax
import jax.numpy as jnp
from jax import lax
from jax.experimental import pallas as pl
from jax.experimental.pallas import tpu as pltpu


# ----------------------------------------------------------------------------
# Tile sizing / VMEM budgeting
# ----------------------------------------------------------------------------
_TARGET_TILE_BYTES = 1 << 20   # ~1 MiB input buffer per grid step (roofline knee)
_MAX_TILE_ROWS = 1024          # rows at/below the measured knee


def _vmem_capacity_bytes():
    """Physical VMEM per TensorCore; only used as an upper clamp on the limit."""
    try:
        info = pltpu.get_tpu_info()
        cap = getattr(info, "vmem_capacity_bytes", None)
        if cap:
            return int(cap)
    except Exception:
        pass
    return 64 << 20   # v7x size; conservative (and harmless) fallback for v5e/v6e


def _sublane_align(dtype):
    """Native sublane packing: 8 rows/vreg for 4B, 16 for 2B, 32 for 1B dtypes."""
    return max(8, 32 // jnp.dtype(dtype).itemsize)


def _pick_rows(total_rows, row_bytes, align):
    """Largest aligned row-tile at or below the roofline knee."""
    t = max(1, _TARGET_TILE_BYTES // max(row_bytes, 1))
    t = min(t, _MAX_TILE_ROWS)
    t = max(align, (t // align) * align)
    if total_rows <= t:
        return total_rows            # full-extent block dim is always legal
    return t


def _vmem_limit(tile_elems, in_itemsize, out_itemsize, vmem_cap):
    # double-buffered in + double-buffered out + ~6 f32 temps per element
    # + constants/headroom.  No 32 MiB floor: keeps headroom on v7x.
    needed = tile_elems * (2 * in_itemsize + 2 * out_itemsize + 6 * 4)
    limit = needed + (6 << 20)
    return int(min(max(limit, 8 << 20), (vmem_cap * 3) // 4))


# ----------------------------------------------------------------------------
# Kernels
# ----------------------------------------------------------------------------
def _ln_lanes_kernel(x_ref, w_ref, b_ref, o_ref, *, eps):
    # channels_last, C on lanes: normalize over the LAST (lane) axis.
    # x_ref: (tile_rows, C), w_ref / b_ref: (1, C)
    x = x_ref[...].astype(jnp.float32)
    mean = jnp.mean(x, axis=-1, keepdims=True)
    xc = x - mean
    var = jnp.mean(xc * xc, axis=-1, keepdims=True)          # biased (matches torch)
    inv = lax.rsqrt(var + eps)
    y = xc * inv * w_ref[...].astype(jnp.float32) + b_ref[...].astype(jnp.float32)
    o_ref[...] = y.astype(o_ref.dtype)


def _ln_lanes_packed_kernel(x_ref, seg_ref, w_ref, b_ref, o_ref, *, eps, inv_c):
    # Lane-dense small-C path: G = 128 // C logical rows packed per 128-lane row.
    # Per-segment sums via one MXU matmul against a block-diagonal ones matrix,
    # so the VPU/store path stays 128-lane dense (no masked vst).
    # x_ref: (tile_rows, 128), seg_ref: (128, 128) f32, w_ref/b_ref: (1, 128) f32
    x = x_ref[...].astype(jnp.float32)
    seg = seg_ref[...]
    mean = jnp.dot(x, seg, preferred_element_type=jnp.float32) * inv_c
    xc = x - mean
    var = jnp.dot(xc * xc, seg, preferred_element_type=jnp.float32) * inv_c
    inv = lax.rsqrt(var + eps)
    y = xc * inv * w_ref[...] + b_ref[...]
    o_ref[...] = y.astype(o_ref.dtype)


def _ln_sublanes_kernel(x_ref, w_ref, b_ref, o_ref, *, eps):
    # channels_first: normalize over the SUBLANE (channel) axis; H*W on lanes.
    # x_ref: (tn, C, tile_hw), w_ref / b_ref: (1, C, 1)
    x = x_ref[...].astype(jnp.float32)
    mean = jnp.mean(x, axis=1, keepdims=True)
    xc = x - mean
    var = jnp.mean(xc * xc, axis=1, keepdims=True)            # biased (matches torch)
    inv = lax.rsqrt(var + eps)
    y = xc * inv * w_ref[...].astype(jnp.float32) + b_ref[...].astype(jnp.float32)
    o_ref[...] = y.astype(o_ref.dtype)


# ----------------------------------------------------------------------------
# pallas_call wrappers
# ----------------------------------------------------------------------------
def _layernorm_channels_last(x2d, weight, bias, eps):
    """LayerNorm over the last axis of a (R, C) slab."""
    R, C = x2d.shape
    vmem_cap = _vmem_capacity_bytes()
    itemsize = x2d.dtype.itemsize
    align = _sublane_align(x2d.dtype)

    if C < 128 and 128 % C == 0 and (R * C) % 128 == 0:
        # Lane-dense packed path.
        G = 128 // C
        Rp = (R * C) // 128
        xp = x2d.reshape(Rp, 128)                              # free (contiguous)
        w_t = jnp.tile(weight.astype(jnp.float32), G).reshape(1, 128)
        b_t = jnp.tile(bias.astype(jnp.float32), G).reshape(1, 128)
        lane = jnp.arange(128, dtype=jnp.int32)
        seg = (lane[:, None] // C == lane[None, :] // C).astype(jnp.float32)

        tile_rows = _pick_rows(Rp, 128 * itemsize, align)
        grid = (pl.cdiv(Rp, tile_rows),)
        yp = pl.pallas_call(
            functools.partial(_ln_lanes_packed_kernel, eps=eps, inv_c=1.0 / C),
            out_shape=jax.ShapeDtypeStruct((Rp, 128), x2d.dtype),
            grid_spec=pltpu.PrefetchScalarGridSpec(
                num_scalar_prefetch=0,
                grid=grid,
                in_specs=[
                    pl.BlockSpec((tile_rows, 128), lambda i: (i, 0)),
                    pl.BlockSpec((128, 128), lambda i: (0, 0)),
                    pl.BlockSpec((1, 128), lambda i: (0, 0)),
                    pl.BlockSpec((1, 128), lambda i: (0, 0)),
                ],
                out_specs=pl.BlockSpec((tile_rows, 128), lambda i: (i, 0)),
            ),
            compiler_params=pltpu.CompilerParams(
                dimension_semantics=("parallel",),
                vmem_limit_bytes=_vmem_limit(tile_rows * 128, itemsize, itemsize,
                                             vmem_cap),
            ),
        )(xp, seg, w_t, b_t)
        return yp.reshape(R, C)

    # Standard path (C >= 128, or C does not pack evenly into 128 lanes).
    # TODO(synk): for C = 96/192 the stores stay ~25% lane-sparse; a fully
    # general repack would need a gather/scatter layout change.
    tile_rows = _pick_rows(R, C * itemsize, align)
    grid = (pl.cdiv(R, tile_rows),)
    return pl.pallas_call(
        functools.partial(_ln_lanes_kernel, eps=eps),
        out_shape=jax.ShapeDtypeStruct((R, C), x2d.dtype),
        grid_spec=pltpu.PrefetchScalarGridSpec(
            num_scalar_prefetch=0,
            grid=grid,
            in_specs=[
                pl.BlockSpec((tile_rows, C), lambda i: (i, 0)),
                pl.BlockSpec((1, C), lambda i: (0, 0)),
                pl.BlockSpec((1, C), lambda i: (0, 0)),
            ],
            out_specs=pl.BlockSpec((tile_rows, C), lambda i: (i, 0)),
        ),
        compiler_params=pltpu.CompilerParams(
            dimension_semantics=("parallel",),
            vmem_limit_bytes=_vmem_limit(tile_rows * C, itemsize, itemsize,
                                         vmem_cap),
        ),
    )(x2d, weight.reshape(1, C), bias.reshape(1, C))


def _layernorm_channels_first(x3, weight, bias, eps):
    """LayerNorm over axis 1 of a (N, C, HW) slab — no transpose, HW lane-dense."""
    N, C, HW = x3.shape
    vmem_cap = _vmem_capacity_bytes()
    itemsize = x3.dtype.itemsize
    img_bytes = C * HW * itemsize

    if img_bytes >= _TARGET_TILE_BYTES or N == 1:
        # Large images: one image per step, tile the (lane-dense) spatial axis.
        tn = 1
        t = max(1, _TARGET_TILE_BYTES // max(C * itemsize, 1))
        t = max(128, (t // 128) * 128)
        tile_hw = HW if HW <= t else t
    else:
        # Small images (ConvNeXt late stages): fold batch into the block so
        # each step moves >= ~1 MiB and the ~0.35 us per-step overhead and
        # short DMAs are amortized.
        tile_hw = HW
        tn = min(N, max(1, _TARGET_TILE_BYTES // img_bytes))
        while N % tn != 0:          # uniform blocks (no ragged batch dim)
            tn -= 1
        # Keep >= 2 grid steps when the work is non-trivial (v7x megacore).
        if tn == N and N > 1 and img_bytes * N > (512 << 10):
            tn = N // 2
            while N % tn != 0:
                tn -= 1

    grid = (pl.cdiv(N, tn), pl.cdiv(HW, tile_hw))
    return pl.pallas_call(
        functools.partial(_ln_sublanes_kernel, eps=eps),
        out_shape=jax.ShapeDtypeStruct((N, C, HW), x3.dtype),
        grid_spec=pltpu.PrefetchScalarGridSpec(
            num_scalar_prefetch=0,
            grid=grid,
            in_specs=[
                pl.BlockSpec((tn, C, tile_hw), lambda n, j: (n, 0, j)),
                pl.BlockSpec((1, C, 1), lambda n, j: (0, 0, 0)),
                pl.BlockSpec((1, C, 1), lambda n, j: (0, 0, 0)),
            ],
            out_specs=pl.BlockSpec((tn, C, tile_hw), lambda n, j: (n, 0, j)),
        ),
        compiler_params=pltpu.CompilerParams(
            dimension_semantics=("parallel", "parallel"),
            vmem_limit_bytes=_vmem_limit(tn * C * tile_hw, itemsize, itemsize,
                                         vmem_cap),
        ),
    )(x3, weight.reshape(1, C, 1), bias.reshape(1, C, 1))


# ----------------------------------------------------------------------------
# Module wrapper (mirrors the PyTorch ConvNeXt LayerNorm)
# ----------------------------------------------------------------------------
class LayerNormPallas:
    def __init__(self, normalized_shape, eps=1e-6, data_format="channels_last"):
        if data_format not in ("channels_last", "channels_first"):
            raise NotImplementedError
        self.C = int(normalized_shape)
        self.eps = float(eps)
        self.data_format = data_format
        # Deterministic init, identical to nn.Parameter(torch.ones/zeros).
        self.weight = jnp.ones((self.C,), dtype=jnp.float32)
        self.bias = jnp.zeros((self.C,), dtype=jnp.float32)

    def __call__(self, x):
        if self.data_format == "channels_last":
            assert x.shape[-1] == self.C
            lead = x.shape[:-1]
            x2d = x.reshape(-1, self.C)                        # free (contiguous)
            y = _layernorm_channels_last(x2d, self.weight, self.bias, self.eps)
            return y.reshape(*lead, self.C)
        else:
            N, C, H, W = x.shape
            assert C == self.C
            x3 = x.reshape(N, C, H * W)                        # free (contiguous)
            y = _layernorm_channels_first(x3, self.weight, self.bias, self.eps)
            return y.reshape(N, C, H, W)


# ----------------------------------------------------------------------------
# Pure-JAX references + tests
# ----------------------------------------------------------------------------
def _ref_channels_first(x, w, b, eps):
    u = jnp.mean(x, axis=1, keepdims=True)
    s = jnp.mean((x - u) ** 2, axis=1, keepdims=True)
    xn = (x - u) / jnp.sqrt(s + eps)
    return w[None, :, None, None] * xn + b[None, :, None, None]


def _ref_channels_last(x, w, b, eps):
    u = jnp.mean(x, axis=-1, keepdims=True)
    s = jnp.mean((x - u) ** 2, axis=-1, keepdims=True)
    return (x - u) / jnp.sqrt(s + eps) * w + b


if __name__ == "__main__":
    key = jax.random.PRNGKey(0)
    k1, k2, k3, k4, k5 = jax.random.split(key, 5)

    # channels_first (NCHW), as used inside ConvNeXt downsample layers.
    x_cf = jax.random.normal(k1, (2, 4, 16, 16), dtype=jnp.float32)
    ln_cf = LayerNormPallas(4, eps=1e-6, data_format="channels_first")
    ln_cf.weight = jax.random.normal(k2, (4,), dtype=jnp.float32)
    ln_cf.bias = jax.random.normal(k3, (4,), dtype=jnp.float32)
    y_cf = jax.block_until_ready(ln_cf(x_cf))
    ref_cf = _ref_channels_first(x_cf, ln_cf.weight, ln_cf.bias, ln_cf.eps)
    assert y_cf.shape == x_cf.shape
    assert jnp.max(jnp.abs(y_cf - ref_cf)) < 1e-4

    # channels_last (NHWC), small C -> lane-dense packed path (MXU segment sum).
    x_cl = jax.random.normal(k4, (2, 16, 16, 4), dtype=jnp.float32)
    ln_cl = LayerNormPallas(4, eps=1e-6, data_format="channels_last")
    ln_cl.weight = jax.random.normal(k2, (4,), dtype=jnp.float32)
    ln_cl.bias = jax.random.normal(k3, (4,), dtype=jnp.float32)
    y_cl = jax.block_until_ready(ln_cl(x_cl))
    ref_cl = _ref_channels_last(x_cl, ln_cl.weight, ln_cl.bias, ln_cl.eps)
    assert y_cl.shape == x_cl.shape
    assert jnp.max(jnp.abs(y_cl - ref_cl)) < 1e-4

    # channels_last with rows = 126 (ragged) and C = 96 (ConvNeXt stem) -> standard path.
    x_cl2 = jax.random.normal(k4, (2, 7, 9, 96), dtype=jnp.float32)
    ln_cl2 = LayerNormPallas(96, eps=1e-6, data_format="channels_last")
    y_cl2 = jax.block_until_ready(ln_cl2(x_cl2))
    ref_cl2 = _ref_channels_last(x_cl2, ln_cl2.weight, ln_cl2.bias, ln_cl2.eps)
    assert jnp.max(jnp.abs(y_cl2 - ref_cl2)) < 1e-4

    # channels_first with H*W = 100 (< 128, not a multiple of 128), batch folded.
    x_cf2 = jax.random.normal(k1, (2, 96, 10, 10), dtype=jnp.float32)
    ln_cf2 = LayerNormPallas(96, eps=1e-6, data_format="channels_first")
    y_cf2 = jax.block_until_ready(ln_cf2(x_cf2))
    ref_cf2 = _ref_channels_first(x_cf2, ln_cf2.weight, ln_cf2.bias, ln_cf2.eps)
    assert jnp.max(jnp.abs(y_cf2 - ref_cf2)) < 1e-4

    # channels_first large image (C=96, HW=56*56): exercises spatial tiling branch.
    x_cf3 = jax.random.normal(k5, (1, 96, 56, 56), dtype=jnp.float32)
    ln_cf3 = LayerNormPallas(96, eps=1e-6, data_format="channels_first")
    y_cf3 = jax.block_until_ready(ln_cf3(x_cf3))
    ref_cf3 = _ref_channels_first(x_cf3, ln_cf3.weight, ln_cf3.bias, ln_cf3.eps)
    assert jnp.max(jnp.abs(y_cf3 - ref_cf3)) < 1e-4

    # channels_last bf16 with C=64: packed path + dtype-aware sublane alignment.
    x_bf = jax.random.normal(k5, (2, 8, 8, 64), dtype=jnp.float32).astype(jnp.bfloat16)
    ln_bf = LayerNormPallas(64, eps=1e-6, data_format="channels_last")
    y_bf = jax.block_until_ready(ln_bf(x_bf))
    ref_bf = _ref_channels_last(x_bf.astype(jnp.float32), ln_bf.weight, ln_bf.bias, ln_bf.eps)
    assert jnp.max(jnp.abs(y_bf.astype(jnp.float32) - ref_bf)) < 0.1

    print("KERNEL_OK")
</pallas_src>

<mosaic_0001>
module attributes {stable_mosaic.version = 11 : i64} {
  func.func @_ln_sublanes_kernel(%arg0: i32, %arg1: i32, %arg2: memref<2x4x256xf32, #tpu.memory_space<vmem>>, %arg3: memref<1x4x1xf32, #tpu.memory_space<vmem>>, %arg4: memref<1x4x1xf32, #tpu.memory_space<vmem>>, %arg5: memref<2x4x256xf32, #tpu.memory_space<vmem>>) attributes {dimension_semantics = [#tpu.dimension_semantics<parallel>, #tpu.dimension_semantics<parallel>], iteration_bounds = array<i64: 1, 1>, scalar_prefetch = 0 : i64, scratch_operands = 0 : i64, tpu.core_type = #tpu.core_type<tc>, window_params = [{transform_indices = @transform_0, window_bounds = array<i64: 2, 4, 256>}, {pipeline_mode = #tpu.pipeline_mode<synchronous>, transform_indices = @transform_1, window_bounds = array<i64: 1, 4, 1>}, {pipeline_mode = #tpu.pipeline_mode<synchronous>, transform_indices = @transform_2, window_bounds = array<i64: 1, 4, 1>}, {transform_indices = @transform_3, window_bounds = array<i64: 2, 4, 256>}]} {
    %c0 = arith.constant 0 : index
    %c0_0 = arith.constant 0 : index
    %c0_1 = arith.constant 0 : index
    %0 = vector.load %arg2[%c0, %c0_0, %c0_1] : memref<2x4x256xf32, #tpu.memory_space<vmem>>, vector<2x4x256xf32>
    %cst = arith.constant dense<0.000000e+00> : vector<2x256xf32>
    %1 = vector.multi_reduction <add>, %0, %cst [1] : vector<2x4x256xf32> to vector<2x256xf32>
    %2 = vector.shape_cast %1 : vector<2x256xf32> to vector<2x1x256xf32>
    %cst_2 = arith.constant 4.000000e+00 : f32
    %3 = vector.broadcast %cst_2 : f32 to vector<2x1x256xf32>
    %4 = arith.divf %2, %3 : vector<2x1x256xf32>
    %5 = vector.broadcast %4 : vector<2x1x256xf32> to vector<2x4x256xf32>
    %6 = arith.subf %0, %5 : vector<2x4x256xf32>
    %7 = arith.mulf %6, %6 : vector<2x4x256xf32>
    %cst_3 = arith.constant dense<0.000000e+00> : vector<2x256xf32>
    %8 = vector.multi_reduction <add>, %7, %cst_3 [1] : vector<2x4x256xf32> to vector<2x256xf32>
    %9 = vector.shape_cast %8 : vector<2x256xf32> to vector<2x1x256xf32>
    %cst_4 = arith.constant 4.000000e+00 : f32
    %10 = vector.broadcast %cst_4 : f32 to vector<2x1x256xf32>
    %11 = arith.divf %9, %10 : vector<2x1x256xf32>
    %cst_5 = arith.constant 9.99999997E-7 : f32
    %12 = vector.broadcast %cst_5 : f32 to vector<2x1x256xf32>
    %13 = arith.addf %11, %12 : vector<2x1x256xf32>
    %14 = math.rsqrt %13 : vector<2x1x256xf32>
    %15 = vector.broadcast %14 : vector<2x1x256xf32> to vector<2x4x256xf32>
    %16 = arith.mulf %6, %15 : vector<2x4x256xf32>
    %c0_6 = arith.constant 0 : index
    %c0_7 = arith.constant 0 : index
    %c0_8 = arith.constant 0 : index
    %17 = vector.load %arg3[%c0_6, %c0_7, %c0_8] : memref<1x4x1xf32, #tpu.memory_space<vmem>>, vector<1x4x1xf32>
    %18 = vector.broadcast %17 : vector<1x4x1xf32> to vector<2x4x256xf32>
    %19 = arith.mulf %16, %18 : vector<2x4x256xf32>
    %c0_9 = arith.constant 0 : index
    %c0_10 = arith.constant 0 : index
    %c0_11 = arith.constant 0 : index
    %20 = vector.load %arg4[%c0_9, %c0_10, %c0_11] : memref<1x4x1xf32, #tpu.memory_space<vmem>>, vector<1x4x1xf32>
    %21 = vector.broadcast %20 : vector<1x4x1xf32> to vector<2x4x256xf32>
    %22 = arith.addf %19, %21 : vector<2x4x256xf32>
    %c0_12 = arith.constant 0 : index
    %c0_13 = arith.constant 0 : index
    %c0_14 = arith.constant 0 : index
    %23 = vector.load %arg5[%c0_12, %c0_13, %c0_14] : memref<2x4x256xf32, #tpu.memory_space<vmem>>, vector<2x4x256xf32>
    tpu.vector_store %arg5[%c0_12, %c0_13, %c0_14], %22 {strides = array<i32>} : memref<2x4x256xf32, #tpu.memory_space<vmem>>, vector<2x4x256xf32>,
    return
  }
  func.func @transform_0(%arg0: i32, %arg1: i32) -> (i32, i32, i32) {
    %c0_i32 = arith.constant 0 : i32
    %c0_i32_0 = arith.constant 0 : i32
    return %arg0, %c0_i32, %arg1 : i32, i32, i32
  }
  func.func @transform_1(%arg0: i32, %arg1: i32) -> (i32, i32, i32) {
    %c0_i32 = arith.constant 0 : i32
    %c0_i32_0 = arith.constant 0 : i32
    %c0_i32_1 = arith.constant 0 : i32
    %c0_i32_2 = arith.constant 0 : i32
    return %c0_i32, %c0_i32_0, %c0_i32_1 : i32, i32, i32
  }
  func.func @transform_2(%arg0: i32, %arg1: i32) -> (i32, i32, i32) {
    %c0_i32 = arith.constant 0 : i32
    %c0_i32_0 = arith.constant 0 : i32
    %c0_i32_1 = arith.constant 0 : i32
    %c0_i32_2 = arith.constant 0 : i32
    return %c0_i32, %c0_i32_0, %c0_i32_1 : i32, i32, i32
  }
  func.func @transform_3(%arg0: i32, %arg1: i32) -> (i32, i32, i32) {
    %c0_i32 = arith.constant 0 : i32
    %c0_i32_0 = arith.constant 0 : i32
    return %arg0, %c0_i32, %arg1 : i32, i32, i32
  }
}

</mosaic_0001>

<bundles_post_ra>
// kernel: tpu_custom_call.1
= control target key start
LH: loop header
LB: loop body
LE: loop exit
PB: predicated region body
PF: predicated region fallthrough
CT: control target
= control target key end

     0   :  { %8 = vsyncpa [#allocation3], 0  ;;  %s301_s0 = inlined_call_operand.hbm [shape: f32[2,4,256], index: 0, kind: input, shape index: {}]   ;;  %s302_s1 = inlined_call_operand.vmem [shape: f32[1,4,1], index: 1, kind: input, shape index: {}]   ;;  %s303_s2 = inlined_call_operand.vmem [shape: f32[1,4,1], index: 2, kind: input, shape index: {}]   ;;  %s304_s3 = inlined_call_operand.hbm [shape: f32[2,4,256], index: 3, kind: output, shape index: {}]  }
   0x1   :  { %9 = vsyncpa [#allocation4], 0  ;;  %s249_s12 = smov [#allocation2]  }
   0x2   :  { %s15_s13 = sshll.u32 %s249_s12, 4  ;;  %s16_s13 = int_to_ptr.vmem [resolvable:$true] %s15_s13 }
   0x3   :  { %s213_s14 = scalar_lea.vmem %s16_s13, 256  ;;  %p218_p1 = scmp.lt.s32.totalorder %s16_s13, %s16_s13 }
   0x4   :  { %p214_p0 = scmp.ne.s32.totalorder %s16_s13, %s213_s14  ;;  %p219_p2 = scmp.lt.s32.totalorder %s213_s14, %s213_s14 }
   0x6   :  { %p220_p3 = por %p219_p2, %p218_p1 }
   0x8   :  { %p221_p4 = pnand %p220_p3, %p214_p0 }
   0xa   :  { %224 = shalt.err (!%p221_p4)
}
   0xb   :  { %s250_s15 = smov 128   ;;  %s251_s16 = smov 8  }
   0xc   :  { %21 = dma.hbm_to_vmem [thread:$0]  %s301_s0, 256, %s16_s13, [#allocation3], %s250_s15, %s250_s15, %s251_s16  }
   0xd   :  { %245 = dma.done.wait [#allocation3], 256  }
   0xe   :  { %246 = vsyncadd [#allocation3], 4294967040  ;;  %v252_v0 = vmov 0   ;;  %v139_v1 = vld [vmem:[%s302_s1] sm:$0xf]  ;;  %v30_v4 = vld [vmem:[#allocation2 + $0x8] sm:$0xff] }
   0xf   :  { %194 = vset.pattern.permute.xlu0 %v252_v0  ;;  %v154_v2 = vld [vmem:[%s303_s2] sm:$0xf]  ;;  %vm37_vm0 = vcmask 1043456   ;;  %v34_v6 = vcombine.high %v30_v4, %v30_v4  ;;  %s254_s0 = smov [#allocation5]  }
  0x10   :  { %142 = vperm.xlu0 %194, %v139_v1   ;;  %v29_v3 = vld [vmem:[#allocation2] sm:$0xff]  ;;  %v52_v9 = vsel %vm37_vm0, %v30_v4, 0.0  ;;  %s176_s1 = sshll.u32 %s254_s0, 4  ;;  %s177_s1 = int_to_ptr.vmem [resolvable:$true] %s176_s1 }
  0x11   :  { %v33_v5 = vcombine.high %v29_v3, %v29_v3  ;;  %v38_v7 = vsel %vm37_vm0, %v29_v3, 0.0  ;;  %v59_v10 = vsel %vm37_vm0, %v34_v6, 0.0  ;;  %v53_v13 = vrot.slane %v52_v9, 4  ;;  %s225_s2 = scalar_lea.vmem %s177_s1, 256  ;;  %p230_p6 = scmp.lt.s32.totalorder %s177_s1, %s177_s1 }
  0x12   :  { %v39_v11 = vrot.slane %v38_v7, 4  ;;  %v60_v14 = vrot.slane %v59_v10, 4  ;;  %p226_p5 = scmp.ne.s32.totalorder %s177_s1, %s225_s2  ;;  %p231_p7 = scmp.lt.s32.totalorder %s225_s2, %s225_s2 }
  0x13   :  { %v45_v8 = vsel %vm37_vm0, %v33_v5, 0.0  ;;  %v54_v17 = vadd.f32 %v53_v13, %v52_v9 }
  0x14   :  { %157 = vperm.xlu0 %194, %v154_v2   ;;  %v46_v12 = vrot.slane %v45_v8, 4  ;;  %v40_v15 = vadd.f32 %v39_v11, %v38_v7  ;;  %v61_v18 = vadd.f32 %v60_v14, %v59_v10  ;;  %p232_p8 = por %p231_p7, %p230_p6 }
  0x15   :  { %v55_v21 = vrot.slane %v54_v17, 2 }
  0x16   :  { %v47_v16 = vadd.f32 %v46_v12, %v45_v8  ;;  %v41_v19 = vrot.slane %v40_v15, 2  ;;  %v62_v22 = vrot.slane %v61_v18, 2  ;;  %p233_p9 = pnand %p232_p8, %p226_p5 }
  0x17   :  { %v56_v25 = vadd.f32 %v55_v21, %v54_v17  ;;  %v147_v21 = vlaneseq }
  0x18   :  { %v48_v20 = vrot.slane %v47_v16, 2  ;;  %v42_v23 = vadd.f32 %v41_v19, %v40_v15  ;;  %v63_v26 = vadd.f32 %v62_v22, %v61_v18  ;;  %v253_v19 = vmov 839922192  }
  0x19   :  { %v57_v29 = vrot.slane %v56_v25, 1 }
  0x1a   :  { %v49_v24 = vadd.f32 %v48_v20, %v47_v16  ;;  %v43_v27 = vrot.slane %v42_v23, 1  ;;  %v64_v30 = vrot.slane %v63_v26, 1  ;;  %v145_v20 = vunpack.c.l.s4 %v253_v19 }
  0x1b   :  { %v58_v33 = vadd.f32 %v57_v29, %v56_v25 }
  0x1c   :  { %v50_v28 = vrot.slane %v49_v24, 1  ;;  %v44_v31 = vadd.f32 %v43_v27, %v42_v23  ;;  %v65_v34 = vadd.f32 %v64_v30, %v63_v26  ;;  %v146_v25 = vunpack.c.0.s8 %v145_v20 }
  0x1d   :  { %v69_v37 = vmul.f32 0.25, %v58_v33  ;;  %v148_v26 = vshrl.u32 %v147_v21, 7 }
  0x1e   :  { %v51_v32 = vadd.f32 %v50_v28, %v49_v24  ;;  %v67_v35 = vmul.f32 0.25, %v44_v31  ;;  %v70_v38 = vmul.f32 0.25, %v65_v34 }
  0x1f   :  { %v149_v28 = vsub.s32 %v146_v25, %v148_v26 }
  0x20   :  { %v68_v36 = vmul.f32 0.25, %v51_v32  ;;  %v76_v40 = vcombine.low %v69_v37, %v70_v38 }
  0x22   :  { %v75_v39 = vcombine.low %v67_v35, %v68_v36  ;;  %v80_v42 = vsub.f32 %v30_v4, %v76_v40 }
  0x24   :  { %v79_v41 = vsub.f32 %v29_v3, %v75_v39  ;;  %v82_v44 = vmul.f32 %v80_v42, %v80_v42 }
  0x26   :  { %v81_v43 = vmul.f32 %v79_v41, %v79_v41  ;;  %v86_v46 = vcombine.high %v82_v44, %v82_v44  ;;  %v103_v48 = vsel %vm37_vm0, %v82_v44, 0.0 }
  0x27   :  { %v104_v52 = vrot.slane %v103_v48, 4 }
  0x28   :  { %v85_v45 = vcombine.high %v81_v43, %v81_v43  ;;  %v89_v47 = vsel %vm37_vm0, %v81_v43, 0.0  ;;  %v110_v51 = vsel %vm37_vm0, %v86_v46, 0.0 }
  0x29   :  { %v90_v50 = vrot.slane %v89_v47, 4  ;;  %v111_v54 = vrot.slane %v110_v51, 4  ;;  %v105_v56 = vadd.f32 %v104_v52, %v103_v48 }
  0x2a   :  { %v96_v49 = vsel %vm37_vm0, %v85_v45, 0.0 }
  0x2b   :  { %v97_v53 = vrot.slane %v96_v49, 4  ;;  %v91_v55 = vadd.f32 %v90_v50, %v89_v47  ;;  %v112_v58 = vadd.f32 %v111_v54, %v110_v51  ;;  %v106_v60 = vrot.slane %v105_v56, 2 }
  0x2d   :  { %v98_v57 = vadd.f32 %v97_v53, %v96_v49  ;;  %v92_v59 = vrot.slane %v91_v55, 2  ;;  %v113_v62 = vrot.slane %v112_v58, 2  ;;  %v107_v0 = vadd.f32 %v106_v60, %v105_v56 }
  0x2f   :  { %v99_v61 = vrot.slane %v98_v57, 2  ;;  %v93_v63 = vadd.f32 %v92_v59, %v91_v55  ;;  %v114_v2 = vadd.f32 %v113_v62, %v112_v58  ;;  %v108_v4 = vrot.slane %v107_v0, 1 }
  0x31   :  { %v100_v1 = vadd.f32 %v99_v61, %v98_v57  ;;  %v94_v3 = vrot.slane %v93_v63, 1  ;;  %v115_v6 = vrot.slane %v114_v2, 1  ;;  %v109_v8 = vadd.f32 %v108_v4, %v107_v0 }
  0x33   :  { %v101_v5 = vrot.slane %v100_v1, 1  ;;  %v95_v7 = vadd.f32 %v94_v3, %v93_v63  ;;  %v116_v10 = vadd.f32 %v115_v6, %v114_v2  ;;  %v119_v12 = vmul.f32 0.25, %v109_v8 }
  0x35   :  { %v102_v9 = vadd.f32 %v101_v5, %v100_v1  ;;  %v117_v11 = vmul.f32 0.25, %v95_v7  ;;  %v120_v14 = vmul.f32 0.25, %v116_v10  ;;  %v123_v16 = vadd.f32 1e-06, %v119_v12 }
  0x37   :  { %v118_v13 = vmul.f32 0.25, %v102_v9  ;;  %v121_v15 = vadd.f32 1e-06, %v117_v11  ;;  %v124_v18 = vadd.f32 1e-06, %v120_v14 }
  0x39   :  { %v122_v17 = vadd.f32 1e-06, %v118_v13  ;;  %197 = vrsqrt.f32 %v121_v15 }
  0x3a   :  { %199 = vrsqrt.f32 %v123_v16 }
  0x3b   :  { %201 = vrsqrt.f32 %v122_v17 }
  0x3c   :  { %203 = vrsqrt.f32 %v124_v18 }
  0x46   :  { %v198_v22 = vpop.eup %197 }
  0x47   :  { %v200_v23 = vpop.eup %199 }
  0x48   :  { %v202_v24 = vpop.eup %201 }
  0x49   :  { %v204_v27 = vpop.eup %203  ;;  %v133_v29 = vcombine.low %v198_v22, %v202_v24 }
  0x4a   :  { %v134_v30 = vcombine.low %v200_v23, %v204_v27 }
  0x4b   :  { %v137_v32 = vmul.f32 %v133_v29, %v79_v41 }
  0x4c   :  { %v138_v33 = vmul.f32 %v134_v30, %v80_v42 }
  0x8b   :  { %v143_v31 = vpop.permute.xlu0 %142 }
  0x8c   :  { %v150_v34 = vrot.slane %v143_v31, %v149_v28 }
  0x8e   :  { %v152_v36 = vmul.f32 %v150_v34, %v137_v32  ;;  %v153_v37 = vmul.f32 %v150_v34, %v138_v33 }
  0x8f   :  { %v158_v35 = vpop.permute.xlu0 %157 }
  0x90   :  { %v165_v38 = vrot.slane %v158_v35, %v149_v28 }
  0x92   :  { %v167_v39 = vadd.f32 %v165_v38, %v152_v36  ;;  %v168_v40 = vadd.f32 %v165_v38, %v153_v37 }
  0x94   :  { %169 = vst [vmem:[#allocation5] sm:$0xff] %v167_v39  ;;  %170 = vst [vmem:[#allocation5 + $0x8] sm:$0xff] %v168_v40 }
  0x95   :  { %236 = shalt.err (!%p233_p9)
}
  0x96   :  { %182 = dma.vmem_to_hbm [thread:$0]  %s177_s1, 256, %s304_s3, [#allocation4], %s250_s15, %s250_s15, %s251_s16  }
  0x97   :  { %247 = dma.done.wait [#allocation4], 256  }
  0x98   :  { %248 = vsyncadd [#allocation4], 4294967040 }
  0x99   :  { %186 = vsyncpa [#allocation3], 1 }
  0x9a   :  { %187 = vsyncpa [#allocation4], 1 }

</bundles_post_ra>
